<compile_context>
chip_gen: v5e
topology: v5e:2x2
jax: 0.10.0
libtpu: 0.0.40
codegen_flags: <defaults>
</compile_context>

<pallas_src>
import jax
import jax.numpy as jnp
from jax.experimental import pallas as pl
from jax.experimental.pallas import tpu as pltpu

EPS = 1e-5                      # PyTorch BatchNorm2d default eps
ACT_DTYPE = jnp.bfloat16        # inter-layer activation storage dtype


def _device_defaults():
    kind = ""
    try:
        kind = jax.devices()[0].device_kind.lower()
    except Exception:
        pass
    if "v7" in kind:            # 64 MiB physical VMEM per TC -> leave double-buffering headroom
        return {"vmem": 44 * 1024 * 1024, "tm": 1024, "tn": 256, "tk": 512}
    if "v6" in kind or "v5" in kind:    # 128 MiB physical VMEM
        return {"vmem": 64 * 1024 * 1024, "tm": 1024, "tn": 512, "tk": 512}
    return {"vmem": 32 * 1024 * 1024, "tm": 512, "tn": 256, "tk": 256}


_CFG = _device_defaults()


def _tile(dim, target, mult):
    """Largest divisor of `dim` <= target and a multiple of `mult`; capped fallback otherwise."""
    if dim <= target:
        return dim
    t = (target // mult) * mult
    while t >= mult:
        if dim % t == 0:
            return t
        t -= mult
    # No aligned divisor <= target: allow a divisor up to 4*target before giving up.
    t = ((target + mult - 1) // mult) * mult
    cap = min(dim, 4 * target)
    while t <= cap:
        if dim % t == 0:
            return t
        t += mult
    # TODO(synk): switch to pl.cdiv grids + masked edge tiles for awkward, prime-ish dims.
    return dim


# --------------------------- BatchNorm statistics plumbing ---------------------------
# All conv kernels emit per-tile (mean, M2) partials of their *output*; this tiny XLA-side
# combine (equal-count pooled variance) produces the (mean, inv_std, gamma, beta) tuple consumed
# by the next kernel's BN+ReLU prologue.  Biased variance == PyTorch train-mode normalization.
# TODO(synk): running_mean / running_var are not tracked (train-mode batch statistics only).

def _combine_stats(stats, rows_per_tile, gamma, beta):
    mu_t = stats[:, 0, :]                                   # (G, C) per-tile means
    m2_t = stats[:, 1, :]                                   # (G, C) per-tile sum of sq. dev.
    g = stats.shape[0]
    mean = jnp.mean(mu_t, axis=0, keepdims=True)            # (1, C)
    m2 = (jnp.sum(m2_t, axis=0, keepdims=True)
          + rows_per_tile * jnp.sum(jnp.square(mu_t - mean), axis=0, keepdims=True))
    var = m2 / (g * rows_per_tile)
    inv = jax.lax.rsqrt(var + EPS)
    return (mean, inv,
            gamma.reshape(1, -1).astype(jnp.float32),
            beta.reshape(1, -1).astype(jnp.float32))


# Per-tile stats of the *group input* (runs once per group).  Fully parallel grid -- no
# accumulation across steps, so both megacore TCs can work on it.
def _input_stats_kernel(x_ref, s_ref):
    x = x_ref[...].astype(jnp.float32)
    mu = jnp.mean(x, axis=0, keepdims=True)
    m2 = jnp.sum(jnp.square(x - mu), axis=0, keepdims=True)
    s_ref[...] = jnp.concatenate([mu, m2], axis=0)[None]


def bn_stats_input(x2d):
    m, c = x2d.shape
    tm = _tile(m, _CFG["tm"], 8)
    tc = _tile(c, 512, 128)
    gm, gc = m // tm, c // tc
    stats = pl.pallas_call(
        _input_stats_kernel,
        out_shape=jax.ShapeDtypeStruct((gm, 2, c), jnp.float32),
        grid=(gm, gc),
        in_specs=[pl.BlockSpec((tm, tc), lambda i, ci: (i, ci))],
        out_specs=pl.BlockSpec((1, 2, tc), lambda i, ci: (i, 0, ci)),
        compiler_params=pltpu.CompilerParams(
            dimension_semantics=("parallel", "parallel"),
            vmem_limit_bytes=_CFG["vmem"]),
    )(x2d)
    return stats, tm


# --------------- fused (BN+ReLU) -> matmul -> (+residual, stats) kernel (1x1 convs) ---------------
# Grid = (M//tm, N//tn, K//tk) with K innermost, f32 VMEM accumulator, init at k==0 and
# epilogue (residual add, per-tile output stats, bf16 store) at k==last.

def _make_matmul_kernel(use_bn, use_res):
    def kernel(*refs):
        idx = 0
        x_ref = refs[idx]; idx += 1
        w_ref = refs[idx]; idx += 1
        if use_bn:
            mean_ref, inv_ref, gamma_ref, beta_ref = refs[idx:idx + 4]
            idx += 4
        if use_res:
            res_ref = refs[idx]; idx += 1
        o_ref = refs[idx]
        stats_ref = refs[idx + 1]
        acc_ref = refs[idx + 2]

        k = pl.program_id(2)

        @pl.when(k == 0)
        def _():
            acc_ref[...] = jnp.zeros_like(acc_ref)

        x = x_ref[...].astype(jnp.float32)                  # BN math in f32 (v5e VPU: no bf16)
        if use_bn:
            x = jnp.maximum(
                (x - mean_ref[...]) * inv_ref[...] * gamma_ref[...] + beta_ref[...], 0.0)
        acc_ref[...] += jnp.dot(x.astype(jnp.bfloat16), w_ref[...],
                                preferred_element_type=jnp.float32)

        @pl.when(k == pl.num_programs(2) - 1)
        def _():
            out = acc_ref[...]
            if use_res:
                out = out + res_ref[...].astype(jnp.float32)    # residual fused into epilogue
            mu = jnp.mean(out, axis=0, keepdims=True)           # per-tile stats for next BN
            m2 = jnp.sum(jnp.square(out - mu), axis=0, keepdims=True)
            stats_ref[...] = jnp.concatenate([mu, m2], axis=0)[None]
            o_ref[...] = out.astype(o_ref.dtype)

    return kernel


def fused_matmul(x2d, w, bn=None, residual2d=None):
    m, k_dim = x2d.shape
    k2, n = w.shape
    assert k_dim == k2
    tm = _tile(m, _CFG["tm"], 8)
    tn = _tile(n, _CFG["tn"], 128)
    tk = _tile(k_dim, _CFG["tk"], 128)
    gm, gn, gk = m // tm, n // tn, k_dim // tk

    in_specs = [pl.BlockSpec((tm, tk), lambda i, j, k: (i, k)),
                pl.BlockSpec((tk, tn), lambda i, j, k: (k, j))]
    args = [x2d, w.astype(jnp.bfloat16)]
    if bn is not None:
        bn_spec = pl.BlockSpec((1, tk), lambda i, j, k: (0, k))
        in_specs += [bn_spec] * 4
        args += list(bn)
    if residual2d is not None:
        in_specs.append(pl.BlockSpec((tm, tn), lambda i, j, k: (i, j)))
        args.append(residual2d)

    out, stats = pl.pallas_call(
        _make_matmul_kernel(bn is not None, residual2d is not None),
        out_shape=(jax.ShapeDtypeStruct((m, n), ACT_DTYPE),
                   jax.ShapeDtypeStruct((gm, 2, n), jnp.float32)),
        grid=(gm, gn, gk),
        in_specs=in_specs,
        out_specs=(pl.BlockSpec((tm, tn), lambda i, j, k: (i, j)),
                   pl.BlockSpec((1, 2, tn), lambda i, j, k: (i, 0, j))),
        scratch_shapes=[pltpu.VMEM((tm, tn), jnp.float32)],
        compiler_params=pltpu.CompilerParams(
            dimension_semantics=("parallel", "parallel", "arbitrary"),
            vmem_limit_bytes=_CFG["vmem"]),
    )(*args)
    return out, stats, tm


# ------------- fused (BN+ReLU) -> 3x3 conv (3 tap matmuls) -> (+residual, stats) kernel -------------
# Grid = (batch, Cout tiles) with the Cout axis "arbitrary" so the per-sample prologue (BN+ReLU,
# zero-pad, kw-concatenation into the persistent VMEM scratch) runs only at cout_tile == 0 and is
# automatically refilled whenever the batch index changes (j resets to 0 for each new b).

def _make_conv3x3_kernel(stride, h, w, ho, wo, cin, use_bn, use_res):
    ksize, pad = 3, 1

    def kernel(*refs):
        idx = 0
        x_ref = refs[idx]; idx += 1
        w_ref = refs[idx]; idx += 1
        if use_bn:
            mean_ref, inv_ref, gamma_ref, beta_ref = refs[idx:idx + 4]
            idx += 4
        if use_res:
            res_ref = refs[idx]; idx += 1
        o_ref = refs[idx]
        stats_ref = refs[idx + 1]
        xcol_ref = refs[idx + 2]
        acc_ref = refs[idx + 3]

        j = pl.program_id(1)

        @pl.when(j == 0)
        def _():
            x = x_ref[0].astype(jnp.float32)                         # (h, w, cin)
            if use_bn:
                x = jnp.maximum(
                    (x - mean_ref[...]) * inv_ref[...] * gamma_ref[...] + beta_ref[...], 0.0)
            # W-pad once, then concatenate the 3 kw shifts along channels so each kh tap is a
            # single matmul with K = 3*cin (better MXU fill, no per-tap unaligned W slicing).
            zcol = jnp.zeros((h, pad, cin), jnp.float32)
            xp = jnp.concatenate([zcol, x, zcol], axis=1)            # (h, w+2, cin)
            cols = jnp.concatenate([xp[:, kw:kw + w, :] for kw in range(ksize)],
                                   axis=-1)                          # (h, w, 3*cin)
            zrow = jnp.zeros((pad, w, ksize * cin), jnp.float32)
            xcol_ref[pl.ds(0, pad), :, :] = zrow                     # top H halo
            xcol_ref[pl.ds(pad + h, pad), :, :] = zrow               # bottom H halo
            xcol_ref[pl.ds(pad, h), :, :] = cols

        # 3 tap matmuls into an explicit f32 VMEM accumulator (no big live value -> no spills).
        for kh in range(ksize):
            if stride == 1:
                win = xcol_ref[pl.ds(kh, ho), :, :]                  # (ho, wo==w, 3*cin)
            else:
                win = xcol_ref[pl.ds(kh, ho, stride), pl.ds(0, wo, stride), :]
            a = win.reshape(ho * wo, ksize * cin)
            contrib = jnp.dot(a.astype(jnp.bfloat16), w_ref[kh],
                              preferred_element_type=jnp.float32)
            if kh == 0:
                acc_ref[...] = contrib
            else:
                acc_ref[...] += contrib

        out = acc_ref[...]
        if use_res:
            out = out + res_ref[0].reshape(ho * wo, -1).astype(jnp.float32)
        mu = jnp.mean(out, axis=0, keepdims=True)                    # per-tile stats for next BN
        m2 = jnp.sum(jnp.square(out - mu), axis=0, keepdims=True)
        stats_ref[...] = jnp.concatenate([mu, m2], axis=0)[None]
        o_ref[0] = out.reshape(ho, wo, -1).astype(o_ref.dtype)

    return kernel


def conv_spatial(x_nhwc, w_hwio, *, stride, bn=None, residual=None):
    n, h, w, cin = x_nhwc.shape
    ksize, pad = 3, 1
    assert w_hwio.shape[0] == ksize and w_hwio.shape[1] == ksize
    cout = w_hwio.shape[-1]
    ho = (h + 2 * pad - ksize) // stride + 1
    wo = (w + 2 * pad - ksize) // stride + 1
    tn = _tile(cout, _CFG["tn"], 128)
    gj = cout // tn
    w_taps = w_hwio.reshape(ksize, ksize * cin, cout).astype(jnp.bfloat16)

    in_specs = [pl.BlockSpec((1, h, w, cin), lambda b, j: (b, 0, 0, 0)),
                pl.BlockSpec((ksize, ksize * cin, tn), lambda b, j: (0, 0, j))]
    args = [x_nhwc, w_taps]
    if bn is not None:
        bn_spec = pl.BlockSpec((1, cin), lambda b, j: (0, 0))
        in_specs += [bn_spec] * 4
        args += list(bn)
    if residual is not None:
        in_specs.append(pl.BlockSpec((1, ho, wo, tn), lambda b, j: (b, 0, 0, j)))
        args.append(residual)

    # TODO(synk): for very large feature maps (v7x's 64 MiB VMEM), add an output-row band grid
    # axis with halo'd input DMA so the scratch holds a row band instead of the whole map.
    out, stats = pl.pallas_call(
        _make_conv3x3_kernel(stride, h, w, ho, wo, cin,
                             bn is not None, residual is not None),
        out_shape=(jax.ShapeDtypeStruct((n, ho, wo, cout), ACT_DTYPE),
                   jax.ShapeDtypeStruct((n, 2, cout), jnp.float32)),
        grid=(n, gj),
        in_specs=in_specs,
        out_specs=(pl.BlockSpec((1, ho, wo, tn), lambda b, j: (b, 0, 0, j)),
                   pl.BlockSpec((1, 2, tn), lambda b, j: (b, 0, j))),
        scratch_shapes=[pltpu.VMEM((h + 2 * pad, w, ksize * cin), jnp.float32),
                        pltpu.VMEM((ho * wo, tn), jnp.float32)],
        compiler_params=pltpu.CompilerParams(
            dimension_semantics=("parallel", "arbitrary"),
            vmem_limit_bytes=_CFG["vmem"]),
    )(*args)
    return out, stats, ho * wo


# ----------------------------- model (parameters & glue) -----------------------------

def init_block_params(key, in_ch, ch, bottleneck):
    ks = jax.random.split(key, 12)
    cmid = ch // 4 if bottleneck else ch

    def nrm(k, shape, s=0.2):
        return s * jax.random.normal(k, shape, jnp.float32)

    p = {"out_channels": ch}
    p["bn0_gamma"] = 1.0 + nrm(ks[0], (in_ch,), 0.1)
    p["bn0_beta"] = nrm(ks[1], (in_ch,), 0.1)
    if bottleneck:
        p["w1"] = nrm(ks[2], (in_ch, cmid))             # 1x1  (Cin, Cout)
        p["bn1_gamma"] = 1.0 + nrm(ks[3], (cmid,), 0.1)
        p["bn1_beta"] = nrm(ks[4], (cmid,), 0.1)
        p["w2"] = nrm(ks[5], (3, 3, cmid, cmid))        # 3x3  HWIO
        p["bn2_gamma"] = 1.0 + nrm(ks[6], (cmid,), 0.1)
        p["bn2_beta"] = nrm(ks[7], (cmid,), 0.1)
        p["w3"] = nrm(ks[8], (cmid, ch))                # 1x1  (Cin, Cout)
    else:
        p["w1"] = nrm(ks[2], (3, 3, in_ch, cmid))       # 3x3  HWIO
        p["bn1_gamma"] = 1.0 + nrm(ks[3], (cmid,), 0.1)
        p["bn1_beta"] = nrm(ks[4], (cmid,), 0.1)
        p["w2"] = nrm(ks[5], (3, 3, cmid, cmid))        # 3x3  HWIO
    p["w_sc"] = nrm(ks[9], (in_ch, ch))                 # 1x1 projection shortcut
    return p


def init_group_params(key, num_blocks, in_channels, channels, bottleneck):
    keys = jax.random.split(key, num_blocks)
    return [
        init_block_params(keys[i], in_channels if i == 0 else channels, channels, bottleneck)
        for i in range(num_blocks)
    ]


def block_v2_forward(x_nhwc, in_stats, in_rows, p, *, bottleneck, stride):
    """Returns (block output NHWC, per-tile stats of the output, rows per stats tile)."""
    n, h, w, in_ch = x_nhwc.shape
    ch = p["out_channels"]
    use_projection = (stride != 1) or (in_ch != ch)
    bn0 = _combine_stats(in_stats, in_rows, p["bn0_gamma"], p["bn0_beta"])
    x2d = x_nhwc.reshape(n * h * w, in_ch)

    if bottleneck:
        cmid = p["w1"].shape[-1]
        if use_projection and stride == 1:
            # Merge the projection shortcut with the first 1x1 conv: x streams from HBM once.
            w_cat = jnp.concatenate([p["w_sc"], p["w1"]], axis=1)          # (in_ch, ch+cmid)
            out_cat, s_cat, rows_cat = fused_matmul(x2d, w_cat, bn=bn0)
            shortcut2d = out_cat[:, :ch]
            r2d = out_cat[:, ch:]
            bn1 = _combine_stats(s_cat[:, :, ch:], rows_cat, p["bn1_gamma"], p["bn1_beta"])
        else:
            r2d, s1, rows1 = fused_matmul(x2d, p["w1"], bn=bn0)            # 1x1, stride 1
            bn1 = _combine_stats(s1, rows1, p["bn1_gamma"], p["bn1_beta"])
            if use_projection:                                             # strided 1x1 shortcut
                x_sub2d = x_nhwc[:, ::stride, ::stride, :].reshape(-1, in_ch)
                shortcut2d, _, _ = fused_matmul(x_sub2d, p["w_sc"], bn=bn0)
            else:
                shortcut2d = None                                          # identity shortcut

        r, s2, rows2 = conv_spatial(r2d.reshape(n, h, w, cmid), p["w2"],
                                    stride=stride, bn=bn1)                 # 3x3, stride
        bn2 = _combine_stats(s2, rows2, p["bn2_gamma"], p["bn2_beta"])
        _, ho, wo, _ = r.shape
        if shortcut2d is None:
            shortcut2d = x_nhwc.reshape(n * ho * wo, ch)
        out2d, s_out, rows_out = fused_matmul(r.reshape(n * ho * wo, cmid), p["w3"],
                                              bn=bn2, residual2d=shortcut2d)   # 1x1 + residual
        return out2d.reshape(n, ho, wo, ch), s_out, rows_out

    else:
        if use_projection:
            if stride == 1:
                shortcut2d, _, _ = fused_matmul(x2d, p["w_sc"], bn=bn0)
            else:  # strided 1x1 shortcut via wrapper-side subsample + gridded matmul
                x_sub2d = x_nhwc[:, ::stride, ::stride, :].reshape(-1, in_ch)
                shortcut2d, _, _ = fused_matmul(x_sub2d, p["w_sc"], bn=bn0)
        r, s1, rows1 = conv_spatial(x_nhwc, p["w1"], stride=stride, bn=bn0)    # 3x3, stride
        _, ho, wo, _ = r.shape
        bn1 = _combine_stats(s1, rows1, p["bn1_gamma"], p["bn1_beta"])
        shortcut = (shortcut2d.reshape(n, ho, wo, ch) if use_projection else x_nhwc)
        out, s_out, rows_out = conv_spatial(r, p["w2"], stride=1, bn=bn1,
                                            residual=shortcut)                # 3x3 + residual
        return out, s_out, rows_out


def block_group_forward(x_nchw, params, *, bottleneck, stride):
    x = jnp.transpose(x_nchw, (0, 2, 3, 1)).astype(jnp.float32)   # NCHW -> NHWC
    n, h, w, c = x.shape
    stats, rows = bn_stats_input(x.reshape(n * h * w, c))         # only stats pass in the group
    for i, p in enumerate(params):
        x, stats, rows = block_v2_forward(
            x, stats, rows, p, bottleneck=bottleneck, stride=stride if i == 0 else 1)
    return jnp.transpose(x.astype(jnp.float32), (0, 3, 1, 2))     # NHWC -> NCHW


# ----------------------------- pure-JAX reference (for checking) -----------------------------

def _ref_bn_relu(x, gamma, beta):
    mean = jnp.mean(x, axis=(0, 1, 2), keepdims=True)
    var = jnp.mean((x - mean) ** 2, axis=(0, 1, 2), keepdims=True)
    return jnp.maximum((x - mean) * jax.lax.rsqrt(var + EPS) * gamma + beta, 0.0)


def _ref_conv(x, w_hwio, stride, pad):
    return jax.lax.conv_general_dilated(
        x, w_hwio, (stride, stride), [(pad, pad), (pad, pad)],
        dimension_numbers=("NHWC", "HWIO", "NHWC"),
        precision=jax.lax.Precision.HIGHEST)


def _ref_block(x, p, bottleneck, stride):
    in_ch = x.shape[-1]
    ch = p["out_channels"]
    use_proj = (stride != 1) or (in_ch != ch)
    h = _ref_bn_relu(x, p["bn0_gamma"], p["bn0_beta"])
    sc = _ref_conv(h, p["w_sc"].reshape((1, 1) + p["w_sc"].shape), stride, 0) if use_proj else x
    if bottleneck:
        r = _ref_conv(h, p["w1"].reshape((1, 1) + p["w1"].shape), 1, 0)
        r = _ref_bn_relu(r, p["bn1_gamma"], p["bn1_beta"])
        r = _ref_conv(r, p["w2"], stride, 1)
        r = _ref_bn_relu(r, p["bn2_gamma"], p["bn2_beta"])
        r = _ref_conv(r, p["w3"].reshape((1, 1) + p["w3"].shape), 1, 0)
    else:
        r = _ref_conv(h, p["w1"], stride, 1)
        r = _ref_bn_relu(r, p["bn1_gamma"], p["bn1_beta"])
        r = _ref_conv(r, p["w2"], 1, 1)
    return r + sc


def _ref_group(x_nchw, params, bottleneck, stride):
    x = jnp.transpose(x_nchw, (0, 2, 3, 1)).astype(jnp.float32)
    for i, p in enumerate(params):
        x = _ref_block(x, p, bottleneck, stride if i == 0 else 1)
    return jnp.transpose(x, (0, 3, 1, 2))


def _check(y, ref, name):
    y = y.astype(jnp.float32)
    err = float(jnp.max(jnp.abs(y - ref)))
    scale = float(jnp.max(jnp.abs(ref))) + 1.0
    # bf16 activations / matmuls vs. f32 reference -> scale-relative tolerance.
    assert err / scale < 5e-2, f"{name} mismatch vs reference: abs={err}, scale={scale}"


# --------------------------------------- main ---------------------------------------

if __name__ == "__main__":
    key = jax.random.PRNGKey(0)
    kx, kp1, kp2, kp3 = jax.random.split(key, 4)

    x = jax.random.normal(kx, (2, 4, 16, 16), jnp.float32)       # NCHW, like PyTorch

    # Bottleneck block group: num_blocks=2, in_channels=4, channels=8, stride=2.
    params_bn = init_group_params(kp1, num_blocks=2, in_channels=4, channels=8, bottleneck=True)
    y_bn = block_group_forward(x, params_bn, bottleneck=True, stride=2)
    jax.block_until_ready(y_bn)
    assert y_bn.shape == (2, 8, 8, 8), y_bn.shape
    _check(y_bn, _ref_group(x, params_bn, True, 2), "bottleneck/stride2")

    # Basic (non-bottleneck) block group with the same sizes.
    params_basic = init_group_params(kp2, num_blocks=2, in_channels=4, channels=8, bottleneck=False)
    y_basic = block_group_forward(x, params_basic, bottleneck=False, stride=2)
    jax.block_until_ready(y_basic)
    assert y_basic.shape == (2, 8, 8, 8), y_basic.shape
    _check(y_basic, _ref_group(x, params_basic, False, 2), "basic/stride2")

    # Stride-1 projection block: exercises the merged (w_sc || w1) matmul path.
    params_s1 = init_group_params(kp3, num_blocks=1, in_channels=4, channels=8, bottleneck=True)
    y_s1 = block_group_forward(x, params_s1, bottleneck=True, stride=1)
    jax.block_until_ready(y_s1)
    assert y_s1.shape == (2, 8, 16, 16), y_s1.shape
    _check(y_s1, _ref_group(x, params_s1, True, 1), "bottleneck/stride1")

    print("KERNEL_OK")
</pallas_src>

<mosaic_0001>
module attributes {stable_mosaic.version = 11 : i64} {
  func.func @_input_stats_kernel(%arg0: i32, %arg1: i32, %arg2: memref<512x4xf32, #tpu.memory_space<vmem>>, %arg3: memref<1x2x4xf32, #tpu.memory_space<vmem>>) attributes {dimension_semantics = [#tpu.dimension_semantics<parallel>, #tpu.dimension_semantics<parallel>], iteration_bounds = array<i64: 1, 1>, scalar_prefetch = 0 : i64, scratch_operands = 0 : i64, tpu.core_type = #tpu.core_type<tc>, window_params = [{transform_indices = @transform_0, window_bounds = array<i64: 512, 4>}, {transform_indices = @transform_1, window_bounds = array<i64: 1, 2, 4>}]} {
    %c0 = arith.constant 0 : index
    %c0_0 = arith.constant 0 : index
    %0 = vector.load %arg2[%c0, %c0_0] : memref<512x4xf32, #tpu.memory_space<vmem>>, vector<512x4xf32>
    %cst = arith.constant dense<0.000000e+00> : vector<4xf32>
    %1 = vector.multi_reduction <add>, %0, %cst [0] : vector<512x4xf32> to vector<4xf32>
    %2 = vector.shape_cast %1 : vector<4xf32> to vector<1x4xf32>
    %cst_1 = arith.constant 5.120000e+02 : f32
    %3 = vector.broadcast %cst_1 : f32 to vector<1x4xf32>
    %4 = arith.divf %2, %3 : vector<1x4xf32>
    %5 = vector.broadcast %4 : vector<1x4xf32> to vector<512x4xf32>
    %6 = arith.subf %0, %5 : vector<512x4xf32>
    %7 = arith.mulf %6, %6 : vector<512x4xf32>
    %cst_2 = arith.constant dense<0.000000e+00> : vector<4xf32>
    %8 = vector.multi_reduction <add>, %7, %cst_2 [0] : vector<512x4xf32> to vector<4xf32>
    %9 = vector.shape_cast %8 : vector<4xf32> to vector<1x4xf32>
    %10 = tpu.concatenate %4, %9 in 0 : vector<1x4xf32>, vector<1x4xf32> -> vector<2x4xf32>
    %11 = vector.shape_cast %10 : vector<2x4xf32> to vector<1x2x4xf32>
    %c0_3 = arith.constant 0 : index
    %c0_4 = arith.constant 0 : index
    %c0_5 = arith.constant 0 : index
    %12 = vector.load %arg3[%c0_3, %c0_4, %c0_5] : memref<1x2x4xf32, #tpu.memory_space<vmem>>, vector<1x2x4xf32>
    tpu.vector_store %arg3[%c0_3, %c0_4, %c0_5], %11 {strides = array<i32>} : memref<1x2x4xf32, #tpu.memory_space<vmem>>, vector<1x2x4xf32>,
    return
  }
  func.func @transform_0(%arg0: i32, %arg1: i32) -> (i32, i32) {
    %c0_i32 = arith.constant 0 : i32
    return %arg0, %arg1 : i32, i32
  }
  func.func @transform_1(%arg0: i32, %arg1: i32) -> (i32, i32, i32) {
    %c0_i32 = arith.constant 0 : i32
    %c0_i32_0 = arith.constant 0 : i32
    return %arg0, %c0_i32, %arg1 : i32, i32, i32
  }
}

</mosaic_0001>

<bundles_post_ra>
// kernel: tpu_custom_call.1
= control target key start
LH: loop header
LB: loop body
LE: loop exit
PB: predicated region body
PF: predicated region fallthrough
CT: control target
= control target key end

     0   :  { %6 = vsyncpa [#allocation3], 0  ;;  %vm73_vm0 = vcmask 31744   ;;  %vm476_vm2 = vcmask 1040384   ;;  %vm478_vm3 = vcmask 25600   ;;  %s1184_s0 = inlined_call_operand.vmem [shape: f32[512,4], index: 0, kind: input, shape index: {}]   ;;  %s1185_s1 = inlined_call_operand.hbm [shape: f32[1,2,4], index: 1, kind: output, shape index: {}]  }
   0x1   :  { %v541_v0 = vld [vmem:[%s1184_s0] sm:$0xff]  ;;  %v546_v1 = vld [vmem:[%s1184_s0 + $0x8] sm:$0xff]  ;;  %v551_v2 = vld [vmem:[%s1184_s0 + $0x10] sm:$0xff]  ;;  %s487_s21 = sshll.u32 %s1185_s1, 4  ;;  %s488_s21 = int_to_ptr.hbm [resolvable:$true] %s487_s21 }
   0x2   :  { %v556_v3 = vld [vmem:[%s1184_s0 + $0x18] sm:$0xff]  ;;  %v74_v4 = vsel %vm73_vm0, %v541_v0, 0.0  ;;  %v75_v5 = vsel %vm73_vm0, %v546_v1, 0.0  ;;  %v565_v6 = vld [vmem:[%s1184_s0 + $0x20] sm:$0xff]  ;;  %v77_v8 = vsel %vm73_vm0, %v551_v2, 0.0  ;;  %v574_v10 = vld [vmem:[%s1184_s0 + $0x28] sm:$0xff] }
   0x3   :  { %v76_v7 = vadd.f32 %v75_v5, %v74_v4  ;;  %v79_v9 = vsel %vm73_vm0, %v556_v3, 0.0  ;;  %v81_v12 = vsel %vm73_vm0, %v565_v6, 0.0  ;;  %v581_v13 = vld [vmem:[%s1184_s0 + $0x30] sm:$0xff]  ;;  %v83_v15 = vsel %vm73_vm0, %v574_v10, 0.0  ;;  %v588_v16 = vld [vmem:[%s1184_s0 + $0x38] sm:$0xff]  ;;  %v595_v19 = vld [vmem:[%s1184_s0 + $0x40] sm:$0xff] }
   0x4   :  { %v85_v18 = vsel %vm73_vm0, %v581_v13, 0.0  ;;  %v87_v21 = vsel %vm73_vm0, %v588_v16, 0.0  ;;  %v602_v22 = vld [vmem:[%s1184_s0 + $0x48] sm:$0xff]  ;;  %v89_v24 = vsel %vm73_vm0, %v595_v19, 0.0  ;;  %v609_v25 = vld [vmem:[%s1184_s0 + $0x50] sm:$0xff]  ;;  %v616_v28 = vld [vmem:[%s1184_s0 + $0x58] sm:$0xff] }
   0x5   :  { %v78_v11 = vadd.f32 %v77_v8, %v76_v7  ;;  %v91_v27 = vsel %vm73_vm0, %v602_v22, 0.0  ;;  %v93_v30 = vsel %vm73_vm0, %v609_v25, 0.0  ;;  %v623_v31 = vld [vmem:[%s1184_s0 + $0x60] sm:$0xff]  ;;  %v95_v33 = vsel %vm73_vm0, %v616_v28, 0.0  ;;  %v630_v34 = vld [vmem:[%s1184_s0 + $0x68] sm:$0xff]  ;;  %v637_v37 = vld [vmem:[%s1184_s0 + $0x70] sm:$0xff] }
   0x6   :  { %v97_v36 = vsel %vm73_vm0, %v623_v31, 0.0  ;;  %v99_v39 = vsel %vm73_vm0, %v630_v34, 0.0  ;;  %v644_v40 = vld [vmem:[%s1184_s0 + $0x78] sm:$0xff]  ;;  %v101_v42 = vsel %vm73_vm0, %v637_v37, 0.0  ;;  %v651_v43 = vld [vmem:[%s1184_s0 + $0x80] sm:$0xff]  ;;  %v658_v46 = vld [vmem:[%s1184_s0 + $0x88] sm:$0xff] }
   0x7   :  { %v80_v14 = vadd.f32 %v79_v9, %v78_v11  ;;  %v103_v45 = vsel %vm73_vm0, %v644_v40, 0.0  ;;  %v105_v48 = vsel %vm73_vm0, %v651_v43, 0.0  ;;  %v665_v49 = vld [vmem:[%s1184_s0 + $0x90] sm:$0xff]  ;;  %v107_v51 = vsel %vm73_vm0, %v658_v46, 0.0  ;;  %v672_v52 = vld [vmem:[%s1184_s0 + $0x98] sm:$0xff]  ;;  %v679_v55 = vld [vmem:[%s1184_s0 + $0xa0] sm:$0xff] }
   0x8   :  { %v109_v54 = vsel %vm73_vm0, %v665_v49, 0.0  ;;  %v111_v57 = vsel %vm73_vm0, %v672_v52, 0.0  ;;  %v686_v58 = vld [vmem:[%s1184_s0 + $0xa8] sm:$0xff]  ;;  %v113_v60 = vsel %vm73_vm0, %v679_v55, 0.0  ;;  %v693_v61 = vld [vmem:[%s1184_s0 + $0xb0] sm:$0xff]  ;;  %v700_v4 = vld [vmem:[%s1184_s0 + $0xb8] sm:$0xff] }
   0x9   :  { %v82_v17 = vadd.f32 %v81_v12, %v80_v14  ;;  %v115_v63 = vsel %vm73_vm0, %v686_v58, 0.0  ;;  %v117_v7 = vsel %vm73_vm0, %v693_v61, 0.0  ;;  %v707_v8 = vld [vmem:[%s1184_s0 + $0xc0] sm:$0xff]  ;;  %v119_v11 = vsel %vm73_vm0, %v700_v4, 0.0  ;;  %v714_v12 = vld [vmem:[%s1184_s0 + $0xc8] sm:$0xff] }
   0xb   :  { %v84_v20 = vadd.f32 %v83_v15, %v82_v17  ;;  %v121_v15 = vsel %vm73_vm0, %v707_v8, 0.0  ;;  %v721_v17 = vld [vmem:[%s1184_s0 + $0xd0] sm:$0xff] }
   0xd   :  { %v86_v23 = vadd.f32 %v85_v18, %v84_v20  ;;  %v123_v20 = vsel %vm73_vm0, %v714_v12, 0.0 }
   0xf   :  { %v88_v26 = vadd.f32 %v87_v21, %v86_v23  ;;  %v728_v21 = vld [vmem:[%s1184_s0 + $0xd8] sm:$0xff] }
  0x11   :  { %v90_v29 = vadd.f32 %v89_v24, %v88_v26  ;;  %v125_v24 = vsel %vm73_vm0, %v721_v17, 0.0  ;;  %v735_v26 = vld [vmem:[%s1184_s0 + $0xe0] sm:$0xff] }
  0x13   :  { %v92_v32 = vadd.f32 %v91_v27, %v90_v29  ;;  %v127_v29 = vsel %vm73_vm0, %v728_v21, 0.0 }
  0x15   :  { %v94_v35 = vadd.f32 %v93_v30, %v92_v32  ;;  %v742_v30 = vld [vmem:[%s1184_s0 + $0xe8] sm:$0xff] }
  0x17   :  { %v96_v38 = vadd.f32 %v95_v33, %v94_v35  ;;  %v129_v33 = vsel %vm73_vm0, %v735_v26, 0.0  ;;  %v749_v35 = vld [vmem:[%s1184_s0 + $0xf0] sm:$0xff] }
  0x19   :  { %v98_v41 = vadd.f32 %v97_v36, %v96_v38  ;;  %v131_v38 = vsel %vm73_vm0, %v742_v30, 0.0 }
  0x1b   :  { %v100_v44 = vadd.f32 %v99_v39, %v98_v41  ;;  %v756_v39 = vld [vmem:[%s1184_s0 + $0xf8] sm:$0xff] }
  0x1d   :  { %v102_v47 = vadd.f32 %v101_v42, %v100_v44  ;;  %v133_v42 = vsel %vm73_vm0, %v749_v35, 0.0  ;;  %v763_v44 = vld [vmem:[%s1184_s0 + $0x100] sm:$0xff] }
  0x1f   :  { %v104_v50 = vadd.f32 %v103_v45, %v102_v47  ;;  %v135_v47 = vsel %vm73_vm0, %v756_v39, 0.0 }
  0x21   :  { %v106_v53 = vadd.f32 %v105_v48, %v104_v50  ;;  %v770_v48 = vld [vmem:[%s1184_s0 + $0x108] sm:$0xff] }
  0x23   :  { %v108_v56 = vadd.f32 %v107_v51, %v106_v53  ;;  %v137_v51 = vsel %vm73_vm0, %v763_v44, 0.0  ;;  %v777_v53 = vld [vmem:[%s1184_s0 + $0x110] sm:$0xff] }
  0x25   :  { %v110_v59 = vadd.f32 %v109_v54, %v108_v56  ;;  %v139_v56 = vsel %vm73_vm0, %v770_v48, 0.0 }
  0x27   :  { %v112_v62 = vadd.f32 %v111_v57, %v110_v59  ;;  %v784_v57 = vld [vmem:[%s1184_s0 + $0x118] sm:$0xff] }
  0x29   :  { %v114_v5 = vadd.f32 %v113_v60, %v112_v62  ;;  %v141_v60 = vsel %vm73_vm0, %v777_v53, 0.0  ;;  %v791_v62 = vld [vmem:[%s1184_s0 + $0x120] sm:$0xff] }
  0x2b   :  { %v116_v9 = vadd.f32 %v115_v63, %v114_v5  ;;  %v143_v5 = vsel %vm73_vm0, %v784_v57, 0.0 }
  0x2d   :  { %v118_v14 = vadd.f32 %v117_v7, %v116_v9  ;;  %v798_v7 = vld [vmem:[%s1184_s0 + $0x128] sm:$0xff] }
  0x2f   :  { %v120_v18 = vadd.f32 %v119_v11, %v118_v14  ;;  %v145_v11 = vsel %vm73_vm0, %v791_v62, 0.0  ;;  %v805_v14 = vld [vmem:[%s1184_s0 + $0x130] sm:$0xff] }
  0x31   :  { %v122_v23 = vadd.f32 %v121_v15, %v120_v18  ;;  %v147_v18 = vsel %vm73_vm0, %v798_v7, 0.0 }
  0x33   :  { %v124_v27 = vadd.f32 %v123_v20, %v122_v23  ;;  %v812_v20 = vld [vmem:[%s1184_s0 + $0x138] sm:$0xff] }
  0x35   :  { %v126_v32 = vadd.f32 %v125_v24, %v124_v27  ;;  %v149_v24 = vsel %vm73_vm0, %v805_v14, 0.0  ;;  %v819_v27 = vld [vmem:[%s1184_s0 + $0x140] sm:$0xff] }
  0x37   :  { %v128_v36 = vadd.f32 %v127_v29, %v126_v32  ;;  %v151_v32 = vsel %vm73_vm0, %v812_v20, 0.0 }
  0x39   :  { %v130_v41 = vadd.f32 %v129_v33, %v128_v36  ;;  %v826_v33 = vld [vmem:[%s1184_s0 + $0x148] sm:$0xff] }
  0x3b   :  { %v132_v45 = vadd.f32 %v131_v38, %v130_v41  ;;  %v153_v38 = vsel %vm73_vm0, %v819_v27, 0.0  ;;  %v833_v41 = vld [vmem:[%s1184_s0 + $0x150] sm:$0xff] }
  0x3d   :  { %v134_v50 = vadd.f32 %v133_v42, %v132_v45  ;;  %v155_v45 = vsel %vm73_vm0, %v826_v33, 0.0 }
  0x3f   :  { %v136_v54 = vadd.f32 %v135_v47, %v134_v50  ;;  %v840_v47 = vld [vmem:[%s1184_s0 + $0x158] sm:$0xff] }
  0x41   :  { %v138_v59 = vadd.f32 %v137_v51, %v136_v54  ;;  %v157_v51 = vsel %vm73_vm0, %v833_v41, 0.0  ;;  %v847_v54 = vld [vmem:[%s1184_s0 + $0x160] sm:$0xff] }
  0x43   :  { %v140_v63 = vadd.f32 %v139_v56, %v138_v59  ;;  %v159_v59 = vsel %vm73_vm0, %v840_v47, 0.0 }
  0x45   :  { %v142_v9 = vadd.f32 %v141_v60, %v140_v63  ;;  %v854_v60 = vld [vmem:[%s1184_s0 + $0x168] sm:$0xff] }
  0x46   :  { %1204 = vst [vmem:[#allocation5_spill] sm:$0xff] %v854_v60 }
  0x47   :  { %v144_v15 = vadd.f32 %v143_v5, %v142_v9  ;;  %v161_v5 = vsel %vm73_vm0, %v847_v54, 0.0  ;;  %v861_v9 = vld [vmem:[%s1184_s0 + $0x170] sm:$0xff] }
  0x48   :  { %1205 = vst [vmem:[#allocation6_spill] sm:$0xff] %v861_v9 }
  0x49   :  { %v146_v23 = vadd.f32 %v145_v11, %v144_v15  ;;  %v163_v15 = vsel %vm73_vm0, %v854_v60, 0.0 }
  0x4b   :  { %v148_v29 = vadd.f32 %v147_v18, %v146_v23  ;;  %v868_v18 = vld [vmem:[%s1184_s0 + $0x178] sm:$0xff] }
  0x4c   :  { %1206 = vst [vmem:[#allocation7_spill] sm:$0xff] %v868_v18 }
  0x4d   :  { %v150_v36 = vadd.f32 %v149_v24, %v148_v29  ;;  %v165_v24 = vsel %vm73_vm0, %v861_v9, 0.0  ;;  %v875_v29 = vld [vmem:[%s1184_s0 + $0x180] sm:$0xff] }
  0x4e   :  { %1207 = vst [vmem:[#allocation8_spill] sm:$0xff] %v875_v29 }
  0x4f   :  { %v152_v42 = vadd.f32 %v151_v32, %v150_v36  ;;  %v167_v36 = vsel %vm73_vm0, %v868_v18, 0.0 }
  0x51   :  { %v154_v50 = vadd.f32 %v153_v38, %v152_v42  ;;  %v882_v38 = vld [vmem:[%s1184_s0 + $0x188] sm:$0xff] }
  0x52   :  { %1208 = vst [vmem:[#allocation9_spill] sm:$0xff] %v882_v38 }
  0x53   :  { %v156_v56 = vadd.f32 %v155_v45, %v154_v50  ;;  %v169_v45 = vsel %vm73_vm0, %v875_v29, 0.0  ;;  %v889_v50 = vld [vmem:[%s1184_s0 + $0x190] sm:$0xff] }
  0x54   :  { %1209 = vst [vmem:[#allocation10_spill] sm:$0xff] %v889_v50 }
  0x55   :  { %v158_v63 = vadd.f32 %v157_v51, %v156_v56  ;;  %v171_v56 = vsel %vm73_vm0, %v882_v38, 0.0 }
  0x57   :  { %v160_v11 = vadd.f32 %v159_v59, %v158_v63  ;;  %v896_v59 = vld [vmem:[%s1184_s0 + $0x198] sm:$0xff] }
  0x58   :  { %1210 = vst [vmem:[#allocation11_spill] sm:$0xff] %v896_v59 }
  0x59   :  { %v162_v23 = vadd.f32 %v161_v5, %v160_v11  ;;  %v173_v5 = vsel %vm73_vm0, %v889_v50, 0.0  ;;  %v903_v11 = vld [vmem:[%s1184_s0 + $0x1a0] sm:$0xff] }
  0x5a   :  { %1211 = vst [vmem:[#allocation12_spill] sm:$0xff] %v903_v11 }
  0x5b   :  { %v164_v32 = vadd.f32 %v163_v15, %v162_v23  ;;  %v175_v23 = vsel %vm73_vm0, %v896_v59, 0.0 }
  0x5d   :  { %v166_v42 = vadd.f32 %v165_v24, %v164_v32  ;;  %v910_v24 = vld [vmem:[%s1184_s0 + $0x1a8] sm:$0xff] }
  0x5e   :  { %1212 = vst [vmem:[#allocation13_spill] sm:$0xff] %v910_v24 }
  0x5f   :  { %v168_v51 = vadd.f32 %v167_v36, %v166_v42  ;;  %v177_v36 = vsel %vm73_vm0, %v903_v11, 0.0  ;;  %v917_v42 = vld [vmem:[%s1184_s0 + $0x1b0] sm:$0xff] }
  0x60   :  { %1213 = vst [vmem:[#allocation14_spill] sm:$0xff] %v917_v42 }
  0x61   :  { %v170_v63 = vadd.f32 %v169_v45, %v168_v51  ;;  %v179_v51 = vsel %vm73_vm0, %v910_v24, 0.0 }
  0x63   :  { %v172_v15 = vadd.f32 %v171_v56, %v170_v63  ;;  %v924_v56 = vld [vmem:[%s1184_s0 + $0x1b8] sm:$0xff] }
  0x64   :  { %1214 = vst [vmem:[#allocation15_spill] sm:$0xff] %v924_v56 }
  0x65   :  { %v174_v32 = vadd.f32 %v173_v5, %v172_v15  ;;  %v181_v5 = vsel %vm73_vm0, %v917_v42, 0.0  ;;  %v931_v15 = vld [vmem:[%s1184_s0 + $0x1c0] sm:$0xff] }
  0x66   :  { %1215 = vst [vmem:[#allocation16_spill] sm:$0xff] %v931_v15 }
  0x67   :  { %v176_v45 = vadd.f32 %v175_v23, %v174_v32  ;;  %v183_v23 = vsel %vm73_vm0, %v924_v56, 0.0  ;;  %v938_v32 = vld [vmem:[%s1184_s0 + $0x1c8] sm:$0xff] }
  0x68   :  { %1216 = vst [vmem:[#allocation17_spill] sm:$0xff] %v938_v32 }
  0x69   :  { %v178_v63 = vadd.f32 %v177_v36, %v176_v45  ;;  %v185_v36 = vsel %vm73_vm0, %v931_v15, 0.0  ;;  %v945_v45 = vld [vmem:[%s1184_s0 + $0x1d0] sm:$0xff] }
  0x6a   :  { %1217 = vst [vmem:[#allocation18_spill] sm:$0xff] %v945_v45 }
  0x6b   :  { %v180_v11 = vadd.f32 %v179_v51, %v178_v63  ;;  %v187_v51 = vsel %vm73_vm0, %v938_v32, 0.0  ;;  %v952_v63 = vld [vmem:[%s1184_s0 + $0x1d8] sm:$0xff] }
  0x6c   :  { %1218 = vst [vmem:[#allocation19_spill] sm:$0xff] %v952_v63  ;;  %v191_v15 = vsel %vm73_vm0, %v952_v63, 0.0 }
  0x6d   :  { %v182_v24 = vadd.f32 %v181_v5, %v180_v11  ;;  %v189_v11 = vsel %vm73_vm0, %v945_v45, 0.0 }
  0x6f   :  { %v184_v42 = vadd.f32 %v183_v23, %v182_v24  ;;  %v961_v24 = vld [vmem:[%s1184_s0 + $0x1e0] sm:$0xff] }
  0x70   :  { %1219 = vst [vmem:[#allocation20_spill] sm:$0xff] %v961_v24  ;;  %v193_v59 = vsel %vm73_vm0, %v961_v24, 0.0 }
  0x71   :  { %v186_v56 = vadd.f32 %v185_v36, %v184_v42  ;;  %v968_v42 = vld [vmem:[%s1184_s0 + $0x1e8] sm:$0xff] }
  0x72   :  { %1220 = vst [vmem:[#allocation21_spill] sm:$0xff] %v968_v42 }
  0x73   :  { %v188_v5 = vadd.f32 %v187_v51, %v186_v56  ;;  %v195_v56 = vsel %vm73_vm0, %v968_v42, 0.0  ;;  %v975_v51 = vld [vmem:[%s1184_s0 + $0x1f0] sm:$0xff] }
  0x74   :  { %1221 = vst [vmem:[#allocation22_spill] sm:$0xff] %v975_v51 }
  0x75   :  { %v190_v23 = vadd.f32 %v189_v11, %v188_v5  ;;  %v982_v11 = vld [vmem:[%s1184_s0 + $0x1f8] sm:$0xff]  ;;  %s527_s0 = smov [#allocation2]  }
  0x76   :  { %s485_s18 = sshll.u32 %s527_s0, 4  ;;  %s486_s18 = int_to_ptr.vmem [resolvable:$true] %s485_s18 }
  0x77   :  { %v192_v32 = vadd.f32 %v191_v15, %v190_v23  ;;  %v197_v15 = vsel %vm73_vm0, %v975_v51, 0.0  ;;  %v526_v23 = vmov 512.0  }
  0x78   :  { %498 = vrcp.f32 %v526_v23 }
  0x79   :  { %v194_v36 = vadd.f32 %v193_v59, %v192_v32  ;;  %v199_v59 = vsel %vm73_vm0, %v982_v11, 0.0 }
  0x7b   :  { %v196_v63 = vadd.f32 %v195_v56, %v194_v36 }
  0x7d   :  { %v198_v5 = vadd.f32 %v197_v15, %v196_v63 }
  0x7e   :  { %v499_v24 = vpop.eup %498 }
  0x7f   :  { %v200_v32 = vadd.f32 %v199_v59, %v198_v5  ;;  %v208_v50 = vmul.f32 512.0, %v499_v24  ;;  %vm212_vm1 = vweird.f32 %v499_v24 }
  0x81   :  { %v201_v42 = vrot.slane %v200_v32, 4  ;;  %v209_v56 = vsub.f32 1.0, %v208_v50 }
  0x83   :  { %v202_v45 = vadd.f32 %v201_v42, %v200_v32  ;;  %v210_v51 = vmul.f32 %v499_v24, %v209_v56 }
  0x85   :  { %v203_v36 = vrot.slane %v202_v45, 2  ;;  %v211_v18 = vadd.f32 %v499_v24, %v210_v51 }
  0x87   :  { %v204_v38 = vadd.f32 %v203_v36, %v202_v45  ;;  %v213_v60 = vsel %vm212_vm1, %v499_v24, %v211_v18 }
  0x89   :  { %v205_v29 = vrot.slane %v204_v38, 1 }
  0x8b   :  { %v206_v9 = vadd.f32 %v205_v29, %v204_v38 }
  0x8d   :  { %v986_v63 = vmul.f32 %v213_v60, %v206_v9 }
  0x8f   :  { %v215_v15 = vsub.f32 %v541_v0, %v986_v63  ;;  %v216_v5 = vsub.f32 %v546_v1, %v986_v63  ;;  %v217_v42 = vsub.f32 %v551_v2, %v986_v63  ;;  %v218_v50 = vsub.f32 %v556_v3, %v986_v63 }
  0x90   :  { %v219_v45 = vsub.f32 %v565_v6, %v986_v63  ;;  %v220_v60 = vsub.f32 %v574_v10, %v986_v63  ;;  %v221_v0 = vsub.f32 %v581_v13, %v986_v63  ;;  %v222_v6 = vsub.f32 %v588_v16, %v986_v63 }
  0x91   :  { %v279_v51 = vmul.f32 %v215_v15, %v215_v15  ;;  %v280_v29 = vmul.f32 %v216_v5, %v216_v5  ;;  %v281_v18 = vmul.f32 %v217_v42, %v217_v42  ;;  %v282_v9 = vmul.f32 %v218_v50, %v218_v50 }
  0x92   :  { %v283_v1 = vmul.f32 %v219_v45, %v219_v45  ;;  %v284_v59 = vmul.f32 %v220_v60, %v220_v60  ;;  %v223_v10 = vsub.f32 %v595_v19, %v986_v63  ;;  %v285_v36 = vmul.f32 %v221_v0, %v221_v0 }
  0x93   :  { %v343_v38 = vsel %vm73_vm0, %v279_v51, 0.0  ;;  %v344_v2 = vsel %vm73_vm0, %v280_v29, 0.0  ;;  %v346_v3 = vsel %vm73_vm0, %v281_v18, 0.0  ;;  %v348_v32 = vsel %vm73_vm0, %v282_v9, 0.0 }
  0x94   :  { %v345_v24 = vadd.f32 %v344_v2, %v343_v38  ;;  %v350_v13 = vsel %vm73_vm0, %v283_v1, 0.0  ;;  %v224_v15 = vsub.f32 %v602_v22, %v986_v63  ;;  %v286_v5 = vmul.f32 %v222_v6, %v222_v6 }
  0x95   :  { %v352_v42 = vsel %vm73_vm0, %v284_v59, 0.0  ;;  %v225_v16 = vsub.f32 %v609_v25, %v986_v63  ;;  %v287_v45 = vmul.f32 %v223_v10, %v223_v10  ;;  %v354_v51 = vsel %vm73_vm0, %v285_v36, 0.0 }
  0x96   :  { %v347_v23 = vadd.f32 %v346_v3, %v345_v24  ;;  %v226_v19 = vsub.f32 %v616_v28, %v986_v63  ;;  %v288_v18 = vmul.f32 %v224_v15, %v224_v15  ;;  %v356_v60 = vsel %vm73_vm0, %v286_v5, 0.0 }
  0x97   :  { %v227_v22 = vsub.f32 %v623_v31, %v986_v63  ;;  %v289_v0 = vmul.f32 %v225_v16, %v225_v16  ;;  %v358_v1 = vsel %vm73_vm0, %v287_v45, 0.0  ;;  %v228_v25 = vsub.f32 %v630_v34, %v986_v63 }
  0x98   :  { %v349_v56 = vadd.f32 %v348_v32, %v347_v23  ;;  %v290_v2 = vmul.f32 %v226_v19, %v226_v19  ;;  %v360_v3 = vsel %vm73_vm0, %v288_v18, 0.0  ;;  %v229_v28 = vsub.f32 %v637_v37, %v986_v63 }
  0x99   :  { %v291_v6 = vmul.f32 %v227_v22, %v227_v22  ;;  %v362_v59 = vsel %vm73_vm0, %v289_v0, 0.0  ;;  %v230_v31 = vsub.f32 %v644_v40, %v986_v63  ;;  %v292_v23 = vmul.f32 %v228_v25, %v228_v25 }
  0x9a   :  { %v351_v50 = vadd.f32 %v350_v13, %v349_v56  ;;  %v364_v10 = vsel %vm73_vm0, %v290_v2, 0.0  ;;  %v231_v34 = vsub.f32 %v651_v43, %v986_v63  ;;  %v293_v13 = vmul.f32 %v229_v28, %v229_v28 }
  0x9b   :  { %v366_v56 = vsel %vm73_vm0, %v291_v6, 0.0  ;;  %v232_v37 = vsub.f32 %v658_v46, %v986_v63  ;;  %v294_v5 = vmul.f32 %v230_v31, %v230_v31  ;;  %v233_v40 = vsub.f32 %v665_v49, %v986_v63 }
  0x9c   :  { %v353_v29 = vadd.f32 %v352_v42, %v351_v50  ;;  %v368_v42 = vsel %vm73_vm0, %v292_v23, 0.0  ;;  %v295_v16 = vmul.f32 %v231_v34, %v231_v34  ;;  %v370_v45 = vsel %vm73_vm0, %v293_v13, 0.0 }
  0x9d   :  { %v234_v43 = vsub.f32 %v672_v52, %v986_v63  ;;  %v372_v19 = vsel %vm73_vm0, %v294_v5, 0.0  ;;  %v235_v46 = vsub.f32 %v679_v55, %v986_v63  ;;  %v236_v49 = vsub.f32 %v686_v58, %v986_v63 }
  0x9e   :  { %v355_v9 = vadd.f32 %v354_v51, %v353_v29  ;;  %v296_v29 = vmul.f32 %v232_v37, %v232_v37  ;;  %v237_v52 = vsub.f32 %v693_v61, %v986_v63  ;;  %v238_v55 = vsub.f32 %v700_v4, %v986_v63 }
  0x9f   :  { %v298_v0 = vmul.f32 %v234_v43, %v234_v43  ;;  %v299_v25 = vmul.f32 %v235_v46, %v235_v46  ;;  %v239_v58 = vsub.f32 %v707_v8, %v986_v63  ;;  %v240_v61 = vsub.f32 %v714_v12, %v986_v63 }
  0xa0   :  { %v357_v38 = vadd.f32 %v356_v60, %v355_v9  ;;  %v297_v60 = vmul.f32 %v233_v40, %v233_v40  ;;  %v374_v9 = vsel %vm73_vm0, %v295_v16, 0.0  ;;  %v302_v23 = vmul.f32 %v238_v55, %v238_v55 }
  0xa1   :  { %v380_v28 = vsel %vm73_vm0, %v298_v0, 0.0  ;;  %v241_v4 = vsub.f32 %v721_v17, %v986_v63  ;;  %v303_v34 = vmul.f32 %v239_v58, %v239_v58  ;;  %v242_v8 = vsub.f32 %v728_v21, %v986_v63 }
  0xa2   :  { %v359_v24 = vadd.f32 %v358_v1, %v357_v38  ;;  %v376_v1 = vsel %vm73_vm0, %v296_v29, 0.0  ;;  %v378_v2 = vsel %vm73_vm0, %v297_v60, 0.0  ;;  %v388_v37 = vsel %vm73_vm0, %v302_v23, 0.0 }
  0xa3   :  { %v243_v12 = vsub.f32 %v735_v26, %v986_v63  ;;  %v244_v17 = vsub.f32 %v742_v30, %v986_v63  ;;  %v306_v16 = vmul.f32 %v242_v8, %v242_v8  ;;  %v245_v21 = vsub.f32 %v749_v35, %v986_v63 }
  0xa4   :  { %v361_v32 = vadd.f32 %v360_v3, %v359_v24  ;;  %v300_v24 = vmul.f32 %v236_v49, %v236_v49  ;;  %v246_v26 = vsub.f32 %v756_v39, %v986_v63  ;;  %v247_v30 = vsub.f32 %v763_v44, %v986_v63 }
  0xa5   :  { %v307_v43 = vmul.f32 %v243_v12, %v243_v12  ;;  %v396_v46 = vsel %vm73_vm0, %v306_v16, 0.0  ;;  %v248_v35 = vsub.f32 %v770_v48, %v986_v63  ;;  %v249_v39 = vsub.f32 %v777_v53, %v986_v63 }
  0xa6   :  { %v363_v36 = vadd.f32 %v362_v59, %v361_v32  ;;  %v301_v59 = vmul.f32 %v237_v52, %v237_v52  ;;  %v382_v32 = vsel %vm73_vm0, %v299_v25, 0.0  ;;  %v310_v0 = vmul.f32 %v246_v26, %v246_v26 }
  0xa7   :  { %v311_v52 = vmul.f32 %v247_v30, %v247_v30  ;;  %v250_v44 = vsub.f32 %v784_v57, %v986_v63  ;;  %v251_v48 = vsub.f32 %v791_v62, %v986_v63  ;;  %v252_v53 = vsub.f32 %v798_v7, %v986_v63 }
  0xa8   :  { %v365_v15 = vadd.f32 %v364_v10, %v363_v36  ;;  %v384_v10 = vsel %vm73_vm0, %v300_v24, 0.0  ;;  %v386_v13 = vsel %vm73_vm0, %v301_v59, 0.0  ;;  %v404_v55 = vsel %vm73_vm0, %v310_v0, 0.0  ;;  %v1225_v0 = vld [vmem:[#allocation8_spill] sm:$0xff] }
  0xa9   :  { %v314_v59 = vmul.f32 %v250_v44, %v250_v44  ;;  %v253_v57 = vsub.f32 %v805_v14, %v986_v63  ;;  %v254_v62 = vsub.f32 %v812_v20, %v986_v63  ;;  %v255_v7 = vsub.f32 %v819_v27, %v986_v63 }
  0xaa   :  { %v367_v50 = vadd.f32 %v366_v56, %v365_v15  ;;  %v304_v15 = vmul.f32 %v240_v61, %v240_v61  ;;  %v315_v61 = vmul.f32 %v251_v48, %v251_v48  ;;  %v256_v14 = vsub.f32 %v826_v33, %v986_v63 }
  0xab   :  { %v257_v20 = vsub.f32 %v833_v41, %v986_v63  ;;  %v319_v12 = vmul.f32 %v255_v7, %v255_v7  ;;  %v258_v27 = vsub.f32 %v840_v47, %v986_v63  ;;  %v259_v33 = vsub.f32 %v847_v54, %v986_v63  ;;  %v1222_v41 = vld [vmem:[#allocation5_spill] sm:$0xff]  ;;  %v1223_v47 = vld [vmem:[#allocation6_spill] sm:$0xff]  ;;  %v1224_v54 = vld [vmem:[#allocation7_spill] sm:$0xff] }
  0xac   :  { %v369_v51 = vadd.f32 %v368_v42, %v367_v50  ;;  %v305_v42 = vmul.f32 %v241_v4, %v241_v4  ;;  %v390_v50 = vsel %vm73_vm0, %v303_v34, 0.0  ;;  %v412_v4 = vsel %vm73_vm0, %v314_v59, 0.0 }
  0xae   :  { %v371_v18 = vadd.f32 %v370_v45, %v369_v51  ;;  %v392_v45 = vsel %vm73_vm0, %v304_v15, 0.0  ;;  %v394_v29 = vsel %vm73_vm0, %v305_v42, 0.0  ;;  %v318_v15 = vmul.f32 %v254_v62, %v254_v62 }
  0xb0   :  { %v373_v22 = vadd.f32 %v372_v19, %v371_v18  ;;  %v308_v18 = vmul.f32 %v244_v17, %v244_v17  ;;  %v420_v17 = vsel %vm73_vm0, %v318_v15, 0.0 }
  0xb2   :  { %v375_v38 = vadd.f32 %v374_v9, %v373_v22  ;;  %v309_v9 = vmul.f32 %v245_v21, %v245_v21  ;;  %v398_v22 = vsel %vm73_vm0, %v307_v43, 0.0  ;;  %v260_v43 = vsub.f32 %v1222_v41, %v986_v63 }
  0xb4   :  { %v377_v3 = vadd.f32 %v376_v1, %v375_v38  ;;  %v400_v1 = vsel %vm73_vm0, %v308_v18, 0.0  ;;  %v402_v25 = vsel %vm73_vm0, %v309_v9, 0.0  ;;  %v261_v18 = vsub.f32 %v1223_v47, %v986_v63 }
  0xb5   :  { %v262_v9 = vsub.f32 %v1224_v54, %v986_v63 }
  0xb6   :  { %v379_v6 = vadd.f32 %v378_v2, %v377_v3  ;;  %v312_v3 = vmul.f32 %v248_v35, %v248_v35 }
  0xb7   :  { %v326_v44 = vmul.f32 %v262_v9, %v262_v9 }
  0xb8   :  { %v381_v31 = vadd.f32 %v380_v28, %v379_v6  ;;  %v313_v28 = vmul.f32 %v249_v39, %v249_v39  ;;  %v406_v6 = vsel %vm73_vm0, %v311_v52, 0.0 }
  0xba   :  { %v383_v36 = vadd.f32 %v382_v32, %v381_v31  ;;  %v408_v32 = vsel %vm73_vm0, %v312_v3, 0.0  ;;  %v410_v23 = vsel %vm73_vm0, %v313_v28, 0.0 }
  0xbc   :  { %v385_v56 = vadd.f32 %v384_v10, %v383_v36  ;;  %v316_v36 = vmul.f32 %v252_v53, %v252_v53  ;;  %v1228_v53 = vld [vmem:[#allocation11_spill] sm:$0xff] }
  0xbd   :  { %v266_v59 = vsub.f32 %v1228_v53, %v986_v63 }
  0xbe   :  { %v387_v5 = vadd.f32 %v386_v13, %v385_v56  ;;  %v317_v13 = vmul.f32 %v253_v57, %v253_v57  ;;  %v414_v56 = vsel %vm73_vm0, %v315_v61, 0.0  ;;  %v1229_v61 = vld [vmem:[#allocation12_spill] sm:$0xff] }
  0xbf   :  { %v330_v7 = vmul.f32 %v266_v59, %v266_v59 }
  0xc0   :  { %v389_v40 = vadd.f32 %v388_v37, %v387_v5  ;;  %v416_v37 = vsel %vm73_vm0, %v316_v36, 0.0  ;;  %v418_v42 = vsel %vm73_vm0, %v317_v13, 0.0 }
  0xc2   :  { %v391_v51 = vadd.f32 %v390_v50, %v389_v40  ;;  %v320_v40 = vmul.f32 %v256_v14, %v256_v14 }
  0xc4   :  { %v393_v19 = vadd.f32 %v392_v45, %v391_v51  ;;  %v321_v45 = vmul.f32 %v257_v20, %v257_v20  ;;  %v422_v51 = vsel %vm73_vm0, %v319_v12, 0.0  ;;  %v1232_v20 = vld [vmem:[#allocation15_spill] sm:$0xff] }
  0xc5   :  { %v270_v12 = vsub.f32 %v1232_v20, %v986_v63 }
  0xc6   :  { %v395_v60 = vadd.f32 %v394_v29, %v393_v19  ;;  %v322_v29 = vmul.f32 %v258_v27, %v258_v27  ;;  %v424_v19 = vsel %vm73_vm0, %v320_v40, 0.0  ;;  %v1233_v40 = vld [vmem:[#allocation16_spill] sm:$0xff] }
  0xc7   :  { %v334_v41 = vmul.f32 %v270_v12, %v270_v12 }
  0xc8   :  { %v397_v49 = vadd.f32 %v396_v46, %v395_v60  ;;  %v323_v46 = vmul.f32 %v259_v33, %v259_v33  ;;  %v426_v60 = vsel %vm73_vm0, %v321_v45, 0.0 }
  0xc9   :  { %v452_v9 = vsel %vm73_vm0, %v334_v41, 0.0 }
  0xca   :  { %v399_v38 = vadd.f32 %v398_v22, %v397_v49  ;;  %v324_v22 = vmul.f32 %v260_v43, %v260_v43  ;;  %v428_v49 = vsel %vm73_vm0, %v322_v29, 0.0  ;;  %v430_v39 = vsel %vm73_vm0, %v323_v46, 0.0 }
  0xcc   :  { %v401_v2 = vadd.f32 %v400_v1, %v399_v38  ;;  %v263_v1 = vsub.f32 %v1225_v0, %v986_v63  ;;  %v325_v38 = vmul.f32 %v261_v18, %v261_v18  ;;  %v432_v3 = vsel %vm73_vm0, %v324_v22, 0.0 }
  0xce   :  { %v403_v24 = vadd.f32 %v402_v25, %v401_v2  ;;  %v1226_v25 = vld [vmem:[#allocation9_spill] sm:$0xff]  ;;  %v327_v28 = vmul.f32 %v263_v1, %v263_v1 }
  0xcf   :  { %v264_v2 = vsub.f32 %v1226_v25, %v986_v63 }
  0xd0   :  { %v405_v58 = vadd.f32 %v404_v55, %v403_v24  ;;  %v1227_v24 = vld [vmem:[#allocation10_spill] sm:$0xff]  ;;  %v438_v62 = vsel %vm73_vm0, %v327_v28, 0.0 }
  0xd1   :  { %v265_v48 = vsub.f32 %v1227_v24, %v986_v63 }
  0xd2   :  { %v407_v31 = vadd.f32 %v406_v6, %v405_v58  ;;  %v434_v6 = vsel %vm73_vm0, %v325_v38, 0.0 }
  0xd4   :  { %v409_v10 = vadd.f32 %v408_v32, %v407_v31  ;;  %v328_v32 = vmul.f32 %v264_v2, %v264_v2  ;;  %v436_v31 = vsel %vm73_vm0, %v326_v44, 0.0 }
  0xd6   :  { %v411_v34 = vadd.f32 %v410_v23, %v409_v10  ;;  %v267_v23 = vsub.f32 %v1229_v61, %v986_v63  ;;  %v329_v10 = vmul.f32 %v265_v48, %v265_v48  ;;  %v440_v13 = vsel %vm73_vm0, %v328_v32, 0.0 }
  0xd8   :  { %v413_v8 = vadd.f32 %v412_v4, %v411_v34  ;;  %v1230_v4 = vld [vmem:[#allocation13_spill] sm:$0xff]  ;;  %v331_v15 = vmul.f32 %v267_v23, %v267_v23 }
  0xd9   :  { %v268_v34 = vsub.f32 %v1230_v4, %v986_v63 }
  0xda   :  { %v415_v5 = vadd.f32 %v414_v56, %v413_v8  ;;  %v1231_v8 = vld [vmem:[#allocation14_spill] sm:$0xff]  ;;  %v446_v33 = vsel %vm73_vm0, %v331_v15, 0.0 }
  0xdb   :  { %v269_v14 = vsub.f32 %v1231_v8, %v986_v63 }
  0xdc   :  { %v417_v50 = vadd.f32 %v416_v37, %v415_v5  ;;  %v442_v37 = vsel %vm73_vm0, %v329_v10, 0.0 }
  0xde   :  { %v419_v16 = vadd.f32 %v418_v42, %v417_v50  ;;  %v332_v42 = vmul.f32 %v268_v34, %v268_v34  ;;  %v444_v50 = vsel %vm73_vm0, %v330_v7, 0.0 }
  0xe0   :  { %v421_v21 = vadd.f32 %v420_v17, %v419_v16  ;;  %v271_v17 = vsub.f32 %v1233_v40, %v986_v63  ;;  %v333_v16 = vmul.f32 %v269_v14, %v269_v14  ;;  %v448_v43 = vsel %vm73_vm0, %v332_v42, 0.0 }
  0xe2   :  { %v423_v26 = vadd.f32 %v422_v51, %v421_v21  ;;  %v1234_v51 = vld [vmem:[#allocation17_spill] sm:$0xff]  ;;  %v335_v47 = vmul.f32 %v271_v17, %v271_v17  ;;  %v450_v18 = vsel %vm73_vm0, %v333_v16, 0.0 }
  0xe3   :  { %v272_v21 = vsub.f32 %v1234_v51, %v986_v63 }
  0xe4   :  { %v425_v30 = vadd.f32 %v424_v19, %v423_v26  ;;  %v1235_v19 = vld [vmem:[#allocation18_spill] sm:$0xff]  ;;  %v454_v1 = vsel %vm73_vm0, %v335_v47, 0.0 }
  0xe5   :  { %v273_v26 = vsub.f32 %v1235_v19, %v986_v63  ;;  %v336_v54 = vmul.f32 %v272_v21, %v272_v21 }
  0xe6   :  { %v427_v35 = vadd.f32 %v426_v60, %v425_v30  ;;  %v1236_v60 = vld [vmem:[#allocation19_spill] sm:$0xff] }
  0xe7   :  { %v274_v30 = vsub.f32 %v1236_v60, %v986_v63  ;;  %v337_v0 = vmul.f32 %v273_v26, %v273_v26  ;;  %v456_v2 = vsel %vm73_vm0, %v336_v54, 0.0 }
  0xe8   :  { %v429_v52 = vadd.f32 %v428_v49, %v427_v35  ;;  %v1237_v49 = vld [vmem:[#allocation20_spill] sm:$0xff] }
  0xe9   :  { %v275_v35 = vsub.f32 %v1237_v49, %v986_v63  ;;  %v338_v25 = vmul.f32 %v274_v30, %v274_v30  ;;  %v458_v48 = vsel %vm73_vm0, %v337_v0, 0.0 }
  0xea   :  { %v431_v55 = vadd.f32 %v430_v39, %v429_v52  ;;  %v1238_v39 = vld [vmem:[#allocation21_spill] sm:$0xff] }
  0xeb   :  { %v276_v52 = vsub.f32 %v1238_v39, %v986_v63  ;;  %v339_v24 = vmul.f32 %v275_v35, %v275_v35  ;;  %v460_v53 = vsel %vm73_vm0, %v338_v25, 0.0 }
  0xec   :  { %v433_v58 = vadd.f32 %v432_v3, %v431_v55  ;;  %v1239_v3 = vld [vmem:[#allocation22_spill] sm:$0xff] }
  0xed   :  { %v277_v55 = vsub.f32 %v1239_v3, %v986_v63 }
  0xee   :  { %v435_v57 = vadd.f32 %v434_v6, %v433_v58  ;;  %v278_v6 = vsub.f32 %v982_v11, %v986_v63  ;;  %v340_v58 = vmul.f32 %v276_v52, %v276_v52 }
  0xef   :  { %v341_v32 = vmul.f32 %v277_v55, %v277_v55 }
  0xf0   :  { %v437_v36 = vadd.f32 %v436_v31, %v435_v57  ;;  %v462_v31 = vsel %vm73_vm0, %v339_v24, 0.0  ;;  %v342_v61 = vmul.f32 %v278_v6, %v278_v6  ;;  %v464_v23 = vsel %vm73_vm0, %v340_v58, 0.0 }
  0xf2   :  { %v439_v56 = vadd.f32 %v438_v62, %v437_v36  ;;  %v466_v62 = vsel %vm73_vm0, %v341_v32, 0.0  ;;  %v468_v4 = vsel %vm73_vm0, %v342_v61, 0.0 }
  0xf4   :  { %v441_v5 = vadd.f32 %v440_v13, %v439_v56 }
  0xf6   :  { %v443_v27 = vadd.f32 %v442_v37, %v441_v5 }
  0xf8   :  { %v445_v45 = vadd.f32 %v444_v50, %v443_v27 }
  0xfa   :  { %v447_v29 = vadd.f32 %v446_v33, %v445_v45 }
  0xfc   :  { %v449_v46 = vadd.f32 %v448_v43, %v447_v29 }
  0xfe   :  { %v451_v22 = vadd.f32 %v450_v18, %v449_v46 }
 0x100   :  { %v453_v38 = vadd.f32 %v452_v9, %v451_v22 }
 0x102   :  { %v455_v44 = vadd.f32 %v454_v1, %v453_v38 }
 0x104   :  { %v457_v28 = vadd.f32 %v456_v2, %v455_v44 }
 0x106   :  { %v459_v59 = vadd.f32 %v458_v48, %v457_v28 }
 0x108   :  { %v461_v57 = vadd.f32 %v460_v53, %v459_v59 }
 0x10a   :  { %v463_v10 = vadd.f32 %v462_v31, %v461_v57 }
 0x10c   :  { %v465_v36 = vadd.f32 %v464_v23, %v463_v10 }
 0x10e   :  { %v467_v34 = vadd.f32 %v466_v62, %v465_v36 }
 0x110   :  { %v469_v7 = vadd.f32 %v468_v4, %v467_v34 }
 0x112   :  { %v470_v11 = vrot.slane %v469_v7, 4 }
 0x114   :  { %v471_v13 = vadd.f32 %v470_v11, %v469_v7 }
 0x116   :  { %v472_v56 = vrot.slane %v471_v13, 2 }
 0x118   :  { %v473_v8 = vadd.f32 %v472_v56, %v471_v13 }
 0x11a   :  { %v474_v14 = vrot.slane %v473_v8, 1 }
 0x11c   :  { %v475_v15 = vadd.f32 %v474_v14, %v473_v8 }
 0x11e   :  { %v477_v37 = vsel %vm476_vm2, %v986_v63, %v475_v15 }
 0x11f   :  { %479 = vst.msk [vmem:[#allocation2] sm:$0x3] %vm478_vm3, %v477_v37 }
 0x120   :  { %490 = dma.vmem_to_hbm [thread:$0]  %s486_s18, 32, %s488_s21, [#allocation3]  }
 0x121   :  { %524 = dma.done.wait [#allocation3], 32  }
 0x122   :  { %525 = vsyncadd [#allocation3], 4294967264 }
 0x123   :  { %495 = vsyncpa [#allocation3], 1 }

</bundles_post_ra>
